<compile_context>
chip_gen: v5e
topology: v5e:2x2
jax: 0.10.0
libtpu: 0.0.40
codegen_flags: <defaults>
</compile_context>

<pallas_src>
import jax
import jax.numpy as jnp
import numpy as np
from jax.experimental import pallas as pl
from jax.experimental.pallas import tpu as pltpu


_NC = 128  # lane-dense number of moment columns (only the first 5 are used)


def _moments_kernel(lig_ref, coord_ref, out_ref):
    # Output block index is constant along the pixel axis -> resident
    # accumulator; initialize on the first reduction step.
    @pl.when(pl.program_id(1) == 0)
    def _():
        out_ref[...] = jnp.zeros_like(out_ref)

    mask = (lig_ref[...] > 0.5).astype(jnp.float32)            # (tb, tp)
    # All five moments [x*x, y*y, x*y, x, 1] in one MXU pass.
    out_ref[...] += jnp.dot(mask, coord_ref[...],
                            preferred_element_type=jnp.float32)


def _coord_matrix(S, P_pad):
    """(P_pad, 128) constant: columns [x*x, y*y, x*y, x, 1, 0...] per pixel."""
    P = S * S
    idx = jnp.arange(P_pad, dtype=jnp.int32)
    valid = (idx < P).astype(jnp.float32)
    x = (idx % S).astype(jnp.float32) - S / 2.0    # varies along width (last dim)
    y = (idx // S).astype(jnp.float32) - S / 2.0   # varies along height
    cols = jnp.stack([x * x, y * y, x * y, x, jnp.ones_like(x)],
                     axis=1) * valid[:, None]
    coord = jnp.zeros((P_pad, _NC), jnp.float32)
    return coord.at[:, :5].set(cols)


def _ligand_moments(ligand):
    """(B,1,S,S) -> (B,5) = [sum x^2, sum y^2, sum x*y, sum x, count] of mask."""
    B = ligand.shape[0]
    S = ligand.shape[2]
    P = S * S

    # Tile sizes: pixel tile is a multiple of 128 (lane-dense), batch tile a
    # multiple of 8 (sublane-dense); both capped so per-step buffers stay in
    # the low-MiB range (fits v5e/v6e/v7x scoped VMEM with double-buffering).
    tp = min(2048, ((P + 127) // 128) * 128)
    P_pad = ((P + tp - 1) // tp) * tp
    tb = min(256, ((B + 7) // 8) * 8)
    B_pad = ((B + tb - 1) // tb) * tb

    lig2 = ligand.astype(jnp.float32).reshape(B, P)
    lig2 = jnp.pad(lig2, ((0, B_pad - B), (0, P_pad - P)))  # zeros -> mask 0
    coord = _coord_matrix(S, P_pad)

    grid = (B_pad // tb, P_pad // tp)
    moments = pl.pallas_call(
        _moments_kernel,
        out_shape=jax.ShapeDtypeStruct((B_pad, _NC), jnp.float32),
        grid=grid,
        in_specs=[
            pl.BlockSpec((tb, tp), lambda b, p: (b, p)),     # ligand tile
            pl.BlockSpec((tp, _NC), lambda b, p: (p, 0)),    # coord tile
        ],
        out_specs=pl.BlockSpec((tb, _NC), lambda b, p: (b, 0)),
        compiler_params=pltpu.CompilerParams(
            dimension_semantics=("parallel", "arbitrary"),
            vmem_limit_bytes=32 * 1024 * 1024),
    )(lig2, coord)
    return moments[:B, :5]


def rmsd_loss(ligand, translation1, rotation1, translation2, rotation2):
    """Pallas-backed RMSDLoss.forward. Returns rmsd of shape (B,)."""
    B = ligand.shape[0]
    m = _ligand_moments(ligand)
    sxx, syy, sxy, sx, cnt = m[:, 0], m[:, 1], m[:, 2], m[:, 3], m[:, 4]

    # Matches the module's quirks: W reduces over the WHOLE batch and
    # C[:, 1] reuses sum(x * mask).
    W = jnp.sum(cnt) + 1e-5
    inv_W = 1.0 / W
    X00 = 2.0 * sxx * inv_W
    X11 = 2.0 * syy * inv_W
    X01 = 2.0 * sxy * inv_W
    X10 = X01
    C0 = sx * inv_W
    C1 = sx * inv_W

    t1 = translation1.astype(jnp.float32).reshape(B, 2)
    t2 = translation2.astype(jnp.float32).reshape(B, 2)
    r1 = rotation1.astype(jnp.float32).reshape(B)
    r2 = rotation2.astype(jnp.float32).reshape(B)
    c1, s1 = jnp.cos(r1), jnp.sin(r1)
    c2, s2 = jnp.cos(r2), jnp.sin(r2)

    T = t1 - t2                                       # (B, 2)
    # R = R2^T @ R1, expanded per batch element.
    R00 = c2 * c1 + s2 * s1
    R01 = -c2 * s1 + s2 * c1
    R10 = -s2 * c1 + c2 * s1
    R11 = s2 * s1 + c2 * c1

    rmsd = jnp.sum(T * T)                             # scalar (whole batch), as in module
    rmsd = rmsd + ((1.0 - R00) * X00 + (-R01) * X01 +
                   (-R10) * X10 + (1.0 - R11) * X11)

    # (R1 - R2) expanded.
    dR00 = c1 - c2
    dR01 = -(s1 - s2)
    dR10 = s1 - s2
    dR11 = c1 - c2
    d0 = T[:, 0] * dR00 + T[:, 1] * dR10
    d1 = T[:, 0] * dR01 + T[:, 1] * dR11
    rmsd = rmsd + 2.0 * (d0 * C0 + d1 * C1)

    # Guard against tiny negative rounding before sqrt (would NaN otherwise).
    return jnp.sqrt(jnp.maximum(rmsd, 0.0))


def _reference(ligand, t1, r1, t2, r2):
    """Plain-JAX re-implementation of the PyTorch module for checking."""
    ligand = ligand.astype(jnp.float32)
    B, _, S, _ = ligand.shape
    xi = jnp.broadcast_to(jnp.arange(S, dtype=jnp.float32) - S / 2.0, (S, S))
    yi = xi.T
    mask = jnp.squeeze((ligand > 0.5).astype(jnp.float32), axis=1)   # (B,S,S)
    W = jnp.sum(mask) + 1e-5
    xm = xi[None] * mask
    ym = yi[None] * mask
    X = jnp.zeros((B, 2, 2), jnp.float32)
    X = X.at[:, 0, 0].set(jnp.sum(xm * xm, axis=(1, 2)))
    X = X.at[:, 1, 1].set(jnp.sum(ym * ym, axis=(1, 2)))
    X = X.at[:, 0, 1].set(jnp.sum(xm * ym, axis=(1, 2)))
    X = X.at[:, 1, 0].set(jnp.sum(ym * xm, axis=(1, 2)))
    C = jnp.zeros((B, 2), jnp.float32)
    C = C.at[:, 0].set(jnp.sum(xm, axis=(1, 2)))
    C = C.at[:, 1].set(jnp.sum(xm, axis=(1, 2)))     # same quirk as the module
    X = 2.0 * X / W
    C = C / W

    T = t1 - t2
    T0 = jnp.stack([jnp.cos(r1), -jnp.sin(r1)], axis=1)
    T1 = jnp.stack([jnp.sin(r1), jnp.cos(r1)], axis=1)
    R1 = jnp.stack([T0, T1], axis=1)
    T0 = jnp.stack([jnp.cos(r2), -jnp.sin(r2)], axis=1)
    T1 = jnp.stack([jnp.sin(r2), jnp.cos(r2)], axis=1)
    R2 = jnp.stack([T0, T1], axis=1)
    R = jnp.matmul(jnp.transpose(R2, (0, 2, 1)), R1)
    I = jnp.broadcast_to(jnp.eye(2, dtype=jnp.float32), (B, 2, 2))
    rmsd = jnp.sum(T * T)
    rmsd = rmsd + jnp.sum((I - R) * X, axis=(1, 2))
    rmsd = rmsd + 2.0 * jnp.sum(jnp.sum(T[:, :, None] * (R1 - R2), axis=1) * C,
                                axis=1)
    return jnp.sqrt(rmsd)


if __name__ == "__main__":
    key = jax.random.PRNGKey(0)
    k1, k2, k3, k4, k5 = jax.random.split(key, 5)

    B, S = 2, 16
    ligand = jax.random.uniform(k1, (B, 1, S, S), dtype=jnp.float32)
    translation1 = jax.random.normal(k2, (B, 2), dtype=jnp.float32)
    translation2 = jax.random.normal(k3, (B, 2), dtype=jnp.float32)
    rotation1 = jax.random.uniform(k4, (B,), dtype=jnp.float32,
                                   minval=-0.5, maxval=0.5)
    rotation2 = jax.random.uniform(k5, (B,), dtype=jnp.float32,
                                   minval=-0.5, maxval=0.5)

    out = rmsd_loss(ligand, translation1, rotation1, translation2, rotation2)
    out = jax.block_until_ready(out)

    ref = _reference(ligand, translation1, rotation1, translation2, rotation2)
    np.testing.assert_allclose(np.asarray(out), np.asarray(ref),
                               rtol=1e-3, atol=1e-3)
    print("KERNEL_OK")
</pallas_src>

<mosaic_0001>
module attributes {stable_mosaic.version = 11 : i64} {
  func.func @_moments_kernel(%arg0: i32, %arg1: i32, %arg2: memref<8x256xf32, #tpu.memory_space<vmem>>, %arg3: memref<256x128xf32, #tpu.memory_space<vmem>>, %arg4: memref<8x128xf32, #tpu.memory_space<vmem>>) attributes {dimension_semantics = [#tpu.dimension_semantics<parallel>, #tpu.dimension_semantics<arbitrary>], iteration_bounds = array<i64: 1, 1>, scalar_prefetch = 0 : i64, scratch_operands = 0 : i64, tpu.core_type = #tpu.core_type<tc>, window_params = [{transform_indices = @transform_0, window_bounds = array<i64: 8, 256>}, {transform_indices = @transform_1, window_bounds = array<i64: 256, 128>}, {transform_indices = @transform_2, window_bounds = array<i64: 8, 128>}]} {
    %c0_i32 = arith.constant 0 : i32
    %0 = arith.cmpi eq, %arg1, %c0_i32 : i32
    %1 = arith.extui %0 : i1 to i32
    %c0_i32_0 = arith.constant 0 : i32
    %2 = arith.cmpi ne, %1, %c0_i32_0 : i32
    scf.if %2 {
      %cst_9 = arith.constant 0.000000e+00 : f32
      %13 = vector.broadcast %cst_9 : f32 to vector<8x128xf32>
      %c0_10 = arith.constant 0 : index
      %c0_11 = arith.constant 0 : index
      %14 = vector.load %arg4[%c0_10, %c0_11] : memref<8x128xf32, #tpu.memory_space<vmem>>, vector<8x128xf32>
      tpu.vector_store %arg4[%c0_10, %c0_11], %13 {strides = array<i32>} : memref<8x128xf32, #tpu.memory_space<vmem>>, vector<8x128xf32>,
    } else {
    }
    %c0 = arith.constant 0 : index
    %c0_1 = arith.constant 0 : index
    %3 = vector.load %arg2[%c0, %c0_1] : memref<8x256xf32, #tpu.memory_space<vmem>>, vector<8x256xf32>
    %cst = arith.constant 5.000000e-01 : f32
    %4 = vector.broadcast %cst : f32 to vector<8x256xf32>
    %5 = arith.cmpf ogt, %3, %4 : vector<8x256xf32>
    %6 = arith.extui %5 : vector<8x256xi1> to vector<8x256xi32>
    %7 = arith.sitofp %6 : vector<8x256xi32> to vector<8x256xf32>
    %c0_2 = arith.constant 0 : index
    %c0_3 = arith.constant 0 : index
    %8 = vector.load %arg4[%c0_2, %c0_3] : memref<8x128xf32, #tpu.memory_space<vmem>>, vector<8x128xf32>
    %c0_4 = arith.constant 0 : index
    %c0_5 = arith.constant 0 : index
    %9 = vector.load %arg3[%c0_4, %c0_5] : memref<256x128xf32, #tpu.memory_space<vmem>>, vector<256x128xf32>
    %cst_6 = arith.constant dense<0.000000e+00> : vector<8x128xf32>
    %10 = tpu.matmul %7, %9, %cst_6 {dimension_numbers = #tpu.dot_dimension_numbers<[1], [0], [0], [1], [0, 0, 1, 1], [], []>} : vector<8x256xf32>, vector<256x128xf32>, vector<8x128xf32> -> vector<8x128xf32>
    %11 = arith.addf %8, %10 : vector<8x128xf32>
    %c0_7 = arith.constant 0 : index
    %c0_8 = arith.constant 0 : index
    %12 = vector.load %arg4[%c0_7, %c0_8] : memref<8x128xf32, #tpu.memory_space<vmem>>, vector<8x128xf32>
    tpu.vector_store %arg4[%c0_7, %c0_8], %11 {strides = array<i32>} : memref<8x128xf32, #tpu.memory_space<vmem>>, vector<8x128xf32>,
    return
  }
  func.func @transform_0(%arg0: i32, %arg1: i32) -> (i32, i32) {
    %c0_i32 = arith.constant 0 : i32
    return %arg0, %arg1 : i32, i32
  }
  func.func @transform_1(%arg0: i32, %arg1: i32) -> (i32, i32) {
    %c0_i32 = arith.constant 0 : i32
    %c0_i32_0 = arith.constant 0 : i32
    return %arg1, %c0_i32 : i32, i32
  }
  func.func @transform_2(%arg0: i32, %arg1: i32) -> (i32, i32) {
    %c0_i32 = arith.constant 0 : i32
    %c0_i32_0 = arith.constant 0 : i32
    return %arg0, %c0_i32 : i32, i32
  }
}

</mosaic_0001>

<bundles_post_ra>
// kernel: tpu_custom_call.1
= control target key start
LH: loop header
LB: loop body
LE: loop exit
PB: predicated region body
PF: predicated region fallthrough
CT: control target
= control target key end

     0   :  { %7 = vsyncpa [#allocation3], 0  ;;  %s267_s0 = inlined_call_operand.hbm [shape: f32[8,256], index: 0, kind: input, shape index: {}]   ;;  %s268_s1 = inlined_call_operand.hbm [shape: f32[256,128], index: 1, kind: input, shape index: {}]   ;;  %s269_s2 = inlined_call_operand.hbm [shape: f32[8,128], index: 2, kind: output, shape index: {}]  }
   0x1   :  { %8 = vsyncpa [#allocation6], 0 }
   0x2   :  { %9 = vsyncpa [#allocation4], 0  ;;  %s15_s11 = sshll.u32 %s267_s0, 4  ;;  %s237_s12 = smov [#allocation2]   ;;  %s16_s11 = int_to_ptr.hbm [resolvable:$true] %s15_s11 }
   0x3   :  { %s17_s13 = sshll.u32 %s237_s12, 4  ;;  %s25_s16 = sshll.u32 %s268_s1, 4  ;;  %s18_s13 = int_to_ptr.vmem [resolvable:$true] %s17_s13  ;;  %s26_s16 = int_to_ptr.hbm [resolvable:$true] %s25_s16 }
   0x4   :  { %20 = dma.hbm_to_vmem [thread:$0]  %s16_s11, 256, %s18_s13, [#allocation3]  }
   0x5   :  { %s238_s17 = smov [#allocation5]   ;;  %s239_s19 = smov 128  }
   0x6   :  { %s27_s18 = sshll.u32 %s238_s17, 4  ;;  %s240_s20 = smov 8   ;;  %s28_s18 = int_to_ptr.vmem [resolvable:$true] %s27_s18 }
   0x7   :  { %33 = dma.hbm_to_vmem [thread:$0]  %s26_s16, 4096, %s28_s18, [#allocation6], %s239_s19, %s239_s19, %s240_s20  }
   0x8   :  { %231 = dma.done.wait [#allocation3], 256  }
   0x9   :  { %232 = vsyncadd [#allocation3], 4294967040 }
   0xa   :  { %233 = dma.done.wait [#allocation6], 4096  }
   0xb   :  { %234 = vsyncadd [#allocation6], 4294963200  ;;  %v71_v0 = vld [vmem:[#allocation5 + $0x78] sm:$0xff]  ;;  %v70_v2 = vld [vmem:[#allocation5 + $0x70] sm:$0xff]  ;;  %v241_v34 = vmov 1.0   ;;  %s242_s0 = smov [#allocation7]  }
   0xc   :  { %v87_v1 = vld [vmem:[#allocation5 + $0xf8] sm:$0xff]  ;;  %88 = vmatpush.msra.mxu0 %v71_v0  ;;  %v86_v3 = vld [vmem:[#allocation5 + $0xf0] sm:$0xff]  ;;  %v69_v4 = vld [vmem:[#allocation5 + $0x68] sm:$0xff]  ;;  %s135_s1 = sshll.u32 %s242_s0, 4  ;;  %s137_s23 = sshll.u32 %s269_s2, 4  ;;  %s136_s1 = int_to_ptr.vmem [resolvable:$true] %s135_s1  ;;  %s138_s23 = int_to_ptr.hbm [resolvable:$true] %s137_s23 }
   0xd   :  { %108 = vmatpush.msra.mxu1 %v87_v1  ;;  %v85_v5 = vld [vmem:[#allocation5 + $0xe8] sm:$0xff]  ;;  %v68_v6 = vld [vmem:[#allocation5 + $0x60] sm:$0xff]  ;;  %v67_v8 = vld [vmem:[#allocation5 + $0x58] sm:$0xff] }
   0xe   :  { %89 = vmatpush.msra.mxu0 %v70_v2  ;;  %v84_v7 = vld [vmem:[#allocation5 + $0xe0] sm:$0xff]  ;;  %v83_v9 = vld [vmem:[#allocation5 + $0xd8] sm:$0xff]  ;;  %v66_v10 = vld [vmem:[#allocation5 + $0x50] sm:$0xff] }
   0xf   :  { %109 = vmatpush.msra.mxu1 %v86_v3  ;;  %v82_v11 = vld [vmem:[#allocation5 + $0xd0] sm:$0xff]  ;;  %v65_v12 = vld [vmem:[#allocation5 + $0x48] sm:$0xff]  ;;  %v64_v14 = vld [vmem:[#allocation5 + $0x40] sm:$0xff] }
  0x10   :  { %90 = vmatpush.msra.mxu0 %v69_v4  ;;  %v81_v13 = vld [vmem:[#allocation5 + $0xc8] sm:$0xff]  ;;  %v80_v15 = vld [vmem:[#allocation5 + $0xc0] sm:$0xff]  ;;  %v63_v16 = vld [vmem:[#allocation5 + $0x38] sm:$0xff] }
  0x11   :  { %110 = vmatpush.msra.mxu1 %v85_v5  ;;  %v79_v17 = vld [vmem:[#allocation5 + $0xb8] sm:$0xff]  ;;  %v62_v18 = vld [vmem:[#allocation5 + $0x30] sm:$0xff]  ;;  %v61_v20 = vld [vmem:[#allocation5 + $0x28] sm:$0xff] }
  0x12   :  { %91 = vmatpush.msra.mxu0 %v68_v6  ;;  %v78_v19 = vld [vmem:[#allocation5 + $0xb0] sm:$0xff]  ;;  %v77_v21 = vld [vmem:[#allocation5 + $0xa8] sm:$0xff]  ;;  %v60_v22 = vld [vmem:[#allocation5 + $0x20] sm:$0xff] }
  0x13   :  { %111 = vmatpush.msra.mxu1 %v84_v7  ;;  %v76_v23 = vld [vmem:[#allocation5 + $0xa0] sm:$0xff]  ;;  %v59_v24 = vld [vmem:[#allocation5 + $0x18] sm:$0xff]  ;;  %v58_v26 = vld [vmem:[#allocation5 + $0x10] sm:$0xff] }
  0x14   :  { %92 = vmatpush.msra.mxu0 %v67_v8  ;;  %v75_v25 = vld [vmem:[#allocation5 + $0x98] sm:$0xff]  ;;  %v74_v27 = vld [vmem:[#allocation5 + $0x90] sm:$0xff]  ;;  %v57_v28 = vld [vmem:[#allocation5 + $0x8] sm:$0xff] }
  0x15   :  { %112 = vmatpush.msra.mxu1 %v83_v9  ;;  %v73_v29 = vld [vmem:[#allocation5 + $0x88] sm:$0xff]  ;;  %v47_v30 = vld [vmem:[#allocation2] sm:$0xff]  ;;  %v48_v31 = vld [vmem:[#allocation2 + $0x8] sm:$0xff] }
  0x16   :  { %93 = vmatpush.msra.mxu0 %v66_v10  ;;  %v56_v32 = vld [vmem:[#allocation5] sm:$0xff]  ;;  %vm49_vm0 = vcmp.gt.f32.partialorder %v47_v30, 0.5  ;;  %vm50_vm1 = vcmp.gt.f32.partialorder %v48_v31, 0.5 }
  0x17   :  { %113 = vmatpush.msra.mxu1 %v82_v11  ;;  %v72_v33 = vld [vmem:[#allocation5 + $0x80] sm:$0xff] }
  0x18   :  { %94 = vmatpush.msra.mxu0 %v65_v12 }
  0x19   :  { %114 = vmatpush.msra.mxu1 %v81_v13 }
  0x1a   :  { %95 = vmatpush.msra.mxu0 %v64_v14 }
  0x1b   :  { %115 = vmatpush.msra.mxu1 %v80_v15 }
  0x1c   :  { %96 = vmatpush.msra.mxu0 %v63_v16 }
  0x1d   :  { %116 = vmatpush.msra.mxu1 %v79_v17 }
  0x1e   :  { %97 = vmatpush.msra.mxu0 %v62_v18 }
  0x1f   :  { %117 = vmatpush.msra.mxu1 %v78_v19 }
  0x20   :  { %98 = vmatpush.msra.mxu0 %v61_v20 }
  0x21   :  { %118 = vmatpush.msra.mxu1 %v77_v21 }
  0x22   :  { %99 = vmatpush.msra.mxu0 %v60_v22 }
  0x23   :  { %119 = vmatpush.msra.mxu1 %v76_v23 }
  0x24   :  { %100 = vmatpush.msra.mxu0 %v59_v24 }
  0x25   :  { %120 = vmatpush.msra.mxu1 %v75_v25 }
  0x26   :  { %101 = vmatpush.msra.mxu0 %v58_v26 }
  0x27   :  { %121 = vmatpush.msra.mxu1 %v74_v27 }
  0x28   :  { %102 = vmatpush.msra.mxu0 %v57_v28 }
  0x29   :  { %122 = vmatpush.msra.mxu1 %v73_v29 }
  0x2a   :  { %103 = vmatpush.msra.mxu0 %v56_v32 }
  0x2b   :  { %123 = vmatpush.msra.mxu1 %v72_v33  ;;  %150 = vmatmul.msk.f32.vlgmr.msra.gmra.mxu0 %vm49_vm0, %v241_v34 }
  0x2c   :  { %151 = vmatmul.msk.f32.vlgmr.msra.gmra.mxu1 %vm50_vm1, %v241_v34 }
  0xa8   :  { %v105_v35 = vpop.f32.mrf.mxu0 }
  0xa9   :  { %v125_v36 = vpop.f32.mrf.mxu1 }
  0xaa   :  { %v126_v37 = vadd.f32 %v125_v36, %v105_v35 }
  0xac   :  { %129 = vst [vmem:[#allocation7] sm:$0xff] %v126_v37 }
  0xad   :  { %140 = dma.vmem_to_hbm [thread:$0]  %s136_s1, 128, %s138_s23, [#allocation4]  }
  0xae   :  { %235 = dma.done.wait [#allocation4], 128  }
  0xaf   :  { %236 = vsyncadd [#allocation4], 4294967168 }
  0xb0   :  { %145 = vsyncpa [#allocation3], 1 }
  0xb1   :  { %146 = vsyncpa [#allocation6], 1 }
  0xb2   :  { %147 = vsyncpa [#allocation4], 1 }

</bundles_post_ra>
